<compile_context>
chip_gen: v5e
topology: v5e:2x2
jax: 0.10.0
libtpu: 0.0.40
codegen_flags: <defaults>
</compile_context>

<pallas_src>
import functools

import jax
import jax.numpy as jnp
from jax.experimental import pallas as pl
from jax.experimental.pallas import tpu as pltpu


def _round_up(x, m):
    return ((x + m - 1) // m) * m


# ----------------------------------------------------------------------------
# Kernel body: one batch tile through all four layers, weights resident in VMEM.
# ----------------------------------------------------------------------------
def dqn_kernel(x_ref, w1_ref, b1_ref, w2_ref, b2_ref, w3_ref, b3_ref,
               w4_ref, b4_ref, out_ref):
    # f32->bf16 cast of the state fused into the kernel (no separate XLA cast op).
    x = x_ref[...].astype(jnp.bfloat16)

    h = jnp.dot(x, w1_ref[...], preferred_element_type=jnp.float32)
    h = jnp.maximum(h + b1_ref[...], 0.0).astype(jnp.bfloat16)

    h = jnp.dot(h, w2_ref[...], preferred_element_type=jnp.float32)
    h = jnp.maximum(h + b2_ref[...], 0.0).astype(jnp.bfloat16)

    h = jnp.dot(h, w3_ref[...], preferred_element_type=jnp.float32)
    h = jnp.maximum(h + b3_ref[...], 0.0).astype(jnp.bfloat16)

    out = jnp.dot(h, w4_ref[...], preferred_element_type=jnp.float32) + b4_ref[...]
    out_ref[...] = out.astype(out_ref.dtype)


# ----------------------------------------------------------------------------
# One-time capability / hardware probes (cached; never in the per-call path).
# ----------------------------------------------------------------------------
@functools.lru_cache(maxsize=None)
def _buffered_one_supported():
    """Probe once whether pipeline_mode=pl.Buffered(1) compiles on this build."""
    try:
        def k(x_ref, w_ref, o_ref):
            o_ref[...] = x_ref[...] + w_ref[...]

        call = pl.pallas_call(
            k,
            out_shape=jax.ShapeDtypeStruct((16, 128), jnp.float32),
            grid_spec=pltpu.PrefetchScalarGridSpec(
                num_scalar_prefetch=0,
                grid=(2,),
                in_specs=[
                    pl.BlockSpec((8, 128), lambda i: (i, 0)),
                    pl.BlockSpec((8, 128), lambda i: (0, 0),
                                 pipeline_mode=pl.Buffered(1)),
                ],
                out_specs=pl.BlockSpec((8, 128), lambda i: (i, 0)),
            ),
        )
        x = jax.ShapeDtypeStruct((16, 128), jnp.float32)
        w = jax.ShapeDtypeStruct((8, 128), jnp.float32)
        jax.jit(call).lower(x, w).compile()
        return True
    except Exception:
        return False


@functools.lru_cache(maxsize=None)
def _vmem_limit_bytes():
    """Generation-aware scoped VMEM limit: ~48 MiB on v7x, ~100 MiB on v5e/v6e."""
    try:
        cap = pltpu.get_tpu_info().vmem_capacity_bytes
    except Exception:
        cap = 128 * 1024 * 1024
    if cap <= 64 * 1024 * 1024:           # v7x: 64 MiB physical per TensorCore
        return 48 * 1024 * 1024
    return 100 * 1024 * 1024              # v5e / v6e: 128 MiB physical


# ----------------------------------------------------------------------------
# pallas_call construction, cached per (padded batch, dims, tile, buffering).
# ----------------------------------------------------------------------------
@functools.lru_cache(maxsize=None)
def _build_call(B_pad, in_dim, fcs, n_pad, tile_b, single_buffer_weights):
    fc1, fc2, fc3 = fcs
    grid = (B_pad // tile_b,)

    def resident(shape):
        # Whole-array block, constant index across the batch grid axis.
        kwargs = {}
        if single_buffer_weights:
            # Grid-invariant block -> double-buffering it only wastes VMEM.
            kwargs["pipeline_mode"] = pl.Buffered(1)
        return pl.BlockSpec(shape, lambda i: (0,) * len(shape), **kwargs)

    flops = 2 * B_pad * (in_dim * fc1 + fc1 * fc2 + fc2 * fc3 + fc3 * n_pad)
    bytes_accessed = (
        B_pad * in_dim * 4                                          # x (f32)
        + (in_dim * fc1 + fc1 * fc2 + fc2 * fc3 + fc3 * n_pad) * 2  # weights (bf16)
        + (fc1 + fc2 + fc3 + n_pad) * 4                             # biases (f32)
        + B_pad * n_pad * 4)                                        # output (f32)

    # TODO(synk): for small DMA-bound batches on v5e/v6e the resident-weight prologue
    # (~17 MiB at width 2048) stays exposed; streaming w2/w3 via pltpu.emit_pipeline or
    # pinning weights across calls (cross-pallas_call futures) would hide it.
    return pl.pallas_call(
        dqn_kernel,
        out_shape=jax.ShapeDtypeStruct((B_pad, n_pad), jnp.float32),
        grid_spec=pltpu.PrefetchScalarGridSpec(
            num_scalar_prefetch=0,
            grid=grid,
            in_specs=[
                pl.BlockSpec((tile_b, in_dim), lambda i: (i, 0)),   # x batch tile (f32)
                resident((in_dim, fc1)), resident((1, fc1)),
                resident((fc1, fc2)), resident((1, fc2)),
                resident((fc2, fc3)), resident((1, fc3)),
                resident((fc3, n_pad)), resident((1, n_pad)),
            ],
            out_specs=pl.BlockSpec((tile_b, n_pad), lambda i: (i, 0)),
        ),
        compiler_params=pltpu.CompilerParams(
            dimension_semantics=("parallel",),
            vmem_limit_bytes=_vmem_limit_bytes(),
        ),
        cost_estimate=pl.CostEstimate(
            flops=flops, transcendentals=0, bytes_accessed=bytes_accessed),
    )


# ----------------------------------------------------------------------------
# Forward pass.
# ----------------------------------------------------------------------------
def _pick_tile_b(B, tile_b=None):
    B8 = _round_up(B, 8)
    if tile_b is None:
        if B8 <= 8:
            tile_b = 8
        else:
            # >= 2 grid steps (so ("parallel",) feeds both v7x TensorCores), tiles
            # capped at 512 rows; weights are resident so bigger tiles only add
            # activation scratch while amortizing grid-step + MXU-RHS-push overhead.
            tile_b = min(512, _round_up(pl.cdiv(B8, 2), 8))
    return max(8, _round_up(min(tile_b, B8), 8))


@functools.partial(jax.jit, static_argnames=("tile_b", "single_buffer"))
def _dqn_forward_impl(state, params, *, tile_b, single_buffer):
    B, in_dim = state.shape
    fc1 = params["w1"].shape[1]
    fc2 = params["w2"].shape[1]
    fc3 = params["w3"].shape[1]
    n_actions = params["w4"].shape[1]

    B_pad = _round_up(B, tile_b)
    # Pad actions to one full 128-lane vreg width (unmasked lane-dense stores).
    # Intentionally NOT widened further: the final layer is a tiny FLOP fraction.
    n_pad = _round_up(n_actions, 128)

    x = state.astype(jnp.float32)
    if B_pad != B:
        x = jnp.pad(x, ((0, B_pad - B), (0, 0)))   # zero rows are safe through ReLU/matmul

    w1 = params["w1"].astype(jnp.bfloat16)
    w2 = params["w2"].astype(jnp.bfloat16)
    w3 = params["w3"].astype(jnp.bfloat16)
    w4 = params["w4"].astype(jnp.bfloat16)
    b1 = params["b1"].astype(jnp.float32)
    b2 = params["b2"].astype(jnp.float32)
    b3 = params["b3"].astype(jnp.float32)
    b4 = params["b4"].astype(jnp.float32)
    if n_pad != n_actions:
        w4 = jnp.pad(w4, ((0, 0), (0, n_pad - n_actions)))
        b4 = jnp.pad(b4, ((0, 0), (0, n_pad - n_actions)))

    call = _build_call(B_pad, in_dim, (fc1, fc2, fc3), n_pad, tile_b, single_buffer)
    out = call(x, w1, b1, w2, b2, w3, b3, w4, b4)
    return out[:B, :n_actions]


def dqn_forward(state, params, *, tile_b=None):
    """state: [B, input_dim] float32. params: w{i} as [in, out] and b{i} as [1, out]."""
    tile_b = _pick_tile_b(state.shape[0], tile_b)
    return _dqn_forward_impl(state, params, tile_b=tile_b,
                             single_buffer=_buffered_one_supported())


# ----------------------------------------------------------------------------
# Params init (PyTorch nn.Linear style) and pure-JAX reference.
# ----------------------------------------------------------------------------
def init_params(key, input_dim, fc1, fc2, fc3, n_actions):
    """PyTorch nn.Linear-style init: U(-1/sqrt(fan_in), 1/sqrt(fan_in))."""
    dims = [(input_dim, fc1), (fc1, fc2), (fc2, fc3), (fc3, n_actions)]
    params = {}
    for idx, (fan_in, fan_out) in enumerate(dims, start=1):
        key, kw, kb = jax.random.split(key, 3)
        bound = 1.0 / jnp.sqrt(jnp.float32(fan_in))
        params[f"w{idx}"] = jax.random.uniform(
            kw, (fan_in, fan_out), jnp.float32, -bound, bound)
        params[f"b{idx}"] = jax.random.uniform(
            kb, (1, fan_out), jnp.float32, -bound, bound)
    return params


def dqn_reference(state, params):
    x = jnp.maximum(state @ params["w1"] + params["b1"], 0.0)
    x = jnp.maximum(x @ params["w2"] + params["b2"], 0.0)
    x = jnp.maximum(x @ params["w3"] + params["b3"], 0.0)
    return x @ params["w4"] + params["b4"]


if __name__ == "__main__":
    # TODO(synk): optimizer (Adam) and MSELoss from the PyTorch module are host-side
    # training plumbing; only the forward pass is implemented as a Pallas kernel.
    BATCH = 80               # deliberately not a multiple of the tile -> exercises batch padding
    INPUT_DIM = 32
    FC1 = FC2 = FC3 = 256    # scaled down from 2048 for a small synthetic run
    N_ACTIONS = 21

    key = jax.random.PRNGKey(0)
    key, kx = jax.random.split(key)
    state = jax.random.normal(kx, (BATCH, INPUT_DIM), jnp.float32)
    params = init_params(key, INPUT_DIM, FC1, FC2, FC3, N_ACTIONS)

    # Explicit tile (3-step batch grid) ...
    actions = jax.block_until_ready(dqn_forward(state, params, tile_b=32))
    # ... second call hits the cached jit + cached pallas_call (hot acting-loop path),
    # and the auto-picked tile (>=2 grid steps) is exercised as well.
    actions = jax.block_until_ready(dqn_forward(state, params, tile_b=32))
    actions_auto = jax.block_until_ready(dqn_forward(state, params))

    ref = dqn_reference(state, params)
    assert actions.shape == (BATCH, N_ACTIONS)
    assert actions_auto.shape == (BATCH, N_ACTIONS)
    # bf16 weights/activations with f32 accumulation: loosened tolerance vs f32 reference.
    assert jnp.allclose(actions, ref, atol=5e-2, rtol=5e-2), \
        float(jnp.max(jnp.abs(actions - ref)))
    assert jnp.allclose(actions_auto, ref, atol=5e-2, rtol=5e-2), \
        float(jnp.max(jnp.abs(actions_auto - ref)))

    print("KERNEL_OK")
</pallas_src>

<mosaic_0001>
module attributes {stable_mosaic.version = 11 : i64} {
  func.func @dqn_kernel(%arg0: i32, %arg1: memref<32x32xf32, #tpu.memory_space<vmem>>, %arg2: memref<32x256xbf16, #tpu.memory_space<vmem>>, %arg3: memref<1x256xf32, #tpu.memory_space<vmem>>, %arg4: memref<256x256xbf16, #tpu.memory_space<vmem>>, %arg5: memref<1x256xf32, #tpu.memory_space<vmem>>, %arg6: memref<256x256xbf16, #tpu.memory_space<vmem>>, %arg7: memref<1x256xf32, #tpu.memory_space<vmem>>, %arg8: memref<256x128xbf16, #tpu.memory_space<vmem>>, %arg9: memref<1x128xf32, #tpu.memory_space<vmem>>, %arg10: memref<32x128xf32, #tpu.memory_space<vmem>>) attributes {dimension_semantics = [#tpu.dimension_semantics<parallel>], iteration_bounds = array<i64: 3>, scalar_prefetch = 0 : i64, scratch_operands = 0 : i64, tpu.core_type = #tpu.core_type<tc>, window_params = [{transform_indices = @transform_0, window_bounds = array<i64: 32, 32>}, {pipeline_mode = #tpu.pipeline_mode<synchronous>, transform_indices = @transform_1, window_bounds = array<i64: 32, 256>}, {pipeline_mode = #tpu.pipeline_mode<synchronous>, transform_indices = @transform_2, window_bounds = array<i64: 1, 256>}, {pipeline_mode = #tpu.pipeline_mode<synchronous>, transform_indices = @transform_3, window_bounds = array<i64: 256, 256>}, {pipeline_mode = #tpu.pipeline_mode<synchronous>, transform_indices = @transform_4, window_bounds = array<i64: 1, 256>}, {pipeline_mode = #tpu.pipeline_mode<synchronous>, transform_indices = @transform_5, window_bounds = array<i64: 256, 256>}, {pipeline_mode = #tpu.pipeline_mode<synchronous>, transform_indices = @transform_6, window_bounds = array<i64: 1, 256>}, {pipeline_mode = #tpu.pipeline_mode<synchronous>, transform_indices = @transform_7, window_bounds = array<i64: 256, 128>}, {pipeline_mode = #tpu.pipeline_mode<synchronous>, transform_indices = @transform_8, window_bounds = array<i64: 1, 128>}, {transform_indices = @transform_9, window_bounds = array<i64: 32, 128>}]} {
    %c0 = arith.constant 0 : index
    %c0_0 = arith.constant 0 : index
    %0 = vector.load %arg1[%c0, %c0_0] : memref<32x32xf32, #tpu.memory_space<vmem>>, vector<32x32xf32>
    %1 = arith.truncf %0 : vector<32x32xf32> to vector<32x32xbf16>
    %c0_1 = arith.constant 0 : index
    %c0_2 = arith.constant 0 : index
    %2 = vector.load %arg2[%c0_1, %c0_2] : memref<32x256xbf16, #tpu.memory_space<vmem>>, vector<32x256xbf16>
    %cst = arith.constant dense<0.000000e+00> : vector<32x256xf32>
    %3 = tpu.matmul %1, %2, %cst {dimension_numbers = #tpu.dot_dimension_numbers<[1], [0], [0], [1], [0, 0, 1, 1], [], []>} : vector<32x32xbf16>, vector<32x256xbf16>, vector<32x256xf32> -> vector<32x256xf32>
    %c0_3 = arith.constant 0 : index
    %c0_4 = arith.constant 0 : index
    %4 = vector.load %arg3[%c0_3, %c0_4] : memref<1x256xf32, #tpu.memory_space<vmem>>, vector<1x256xf32>
    %5 = vector.broadcast %4 : vector<1x256xf32> to vector<32x256xf32>
    %6 = arith.addf %3, %5 : vector<32x256xf32>
    %cst_5 = arith.constant 0.000000e+00 : f32
    %7 = vector.broadcast %cst_5 : f32 to vector<32x256xf32>
    %8 = arith.maximumf %6, %7 : vector<32x256xf32>
    %9 = arith.truncf %8 : vector<32x256xf32> to vector<32x256xbf16>
    %c0_6 = arith.constant 0 : index
    %c0_7 = arith.constant 0 : index
    %10 = vector.load %arg4[%c0_6, %c0_7] : memref<256x256xbf16, #tpu.memory_space<vmem>>, vector<256x256xbf16>
    %cst_8 = arith.constant dense<0.000000e+00> : vector<32x256xf32>
    %11 = tpu.matmul %9, %10, %cst_8 {dimension_numbers = #tpu.dot_dimension_numbers<[1], [0], [0], [1], [0, 0, 1, 1], [], []>} : vector<32x256xbf16>, vector<256x256xbf16>, vector<32x256xf32> -> vector<32x256xf32>
    %c0_9 = arith.constant 0 : index
    %c0_10 = arith.constant 0 : index
    %12 = vector.load %arg5[%c0_9, %c0_10] : memref<1x256xf32, #tpu.memory_space<vmem>>, vector<1x256xf32>
    %13 = vector.broadcast %12 : vector<1x256xf32> to vector<32x256xf32>
    %14 = arith.addf %11, %13 : vector<32x256xf32>
    %cst_11 = arith.constant 0.000000e+00 : f32
    %15 = vector.broadcast %cst_11 : f32 to vector<32x256xf32>
    %16 = arith.maximumf %14, %15 : vector<32x256xf32>
    %17 = arith.truncf %16 : vector<32x256xf32> to vector<32x256xbf16>
    %c0_12 = arith.constant 0 : index
    %c0_13 = arith.constant 0 : index
    %18 = vector.load %arg6[%c0_12, %c0_13] : memref<256x256xbf16, #tpu.memory_space<vmem>>, vector<256x256xbf16>
    %cst_14 = arith.constant dense<0.000000e+00> : vector<32x256xf32>
    %19 = tpu.matmul %17, %18, %cst_14 {dimension_numbers = #tpu.dot_dimension_numbers<[1], [0], [0], [1], [0, 0, 1, 1], [], []>} : vector<32x256xbf16>, vector<256x256xbf16>, vector<32x256xf32> -> vector<32x256xf32>
    %c0_15 = arith.constant 0 : index
    %c0_16 = arith.constant 0 : index
    %20 = vector.load %arg7[%c0_15, %c0_16] : memref<1x256xf32, #tpu.memory_space<vmem>>, vector<1x256xf32>
    %21 = vector.broadcast %20 : vector<1x256xf32> to vector<32x256xf32>
    %22 = arith.addf %19, %21 : vector<32x256xf32>
    %cst_17 = arith.constant 0.000000e+00 : f32
    %23 = vector.broadcast %cst_17 : f32 to vector<32x256xf32>
    %24 = arith.maximumf %22, %23 : vector<32x256xf32>
    %25 = arith.truncf %24 : vector<32x256xf32> to vector<32x256xbf16>
    %c0_18 = arith.constant 0 : index
    %c0_19 = arith.constant 0 : index
    %26 = vector.load %arg8[%c0_18, %c0_19] : memref<256x128xbf16, #tpu.memory_space<vmem>>, vector<256x128xbf16>
    %cst_20 = arith.constant dense<0.000000e+00> : vector<32x128xf32>
    %27 = tpu.matmul %25, %26, %cst_20 {dimension_numbers = #tpu.dot_dimension_numbers<[1], [0], [0], [1], [0, 0, 1, 1], [], []>} : vector<32x256xbf16>, vector<256x128xbf16>, vector<32x128xf32> -> vector<32x128xf32>
    %c0_21 = arith.constant 0 : index
    %c0_22 = arith.constant 0 : index
    %28 = vector.load %arg9[%c0_21, %c0_22] : memref<1x128xf32, #tpu.memory_space<vmem>>, vector<1x128xf32>
    %29 = vector.broadcast %28 : vector<1x128xf32> to vector<32x128xf32>
    %30 = arith.addf %27, %29 : vector<32x128xf32>
    %c0_23 = arith.constant 0 : index
    %c0_24 = arith.constant 0 : index
    %31 = vector.load %arg10[%c0_23, %c0_24] : memref<32x128xf32, #tpu.memory_space<vmem>>, vector<32x128xf32>
    tpu.vector_store %arg10[%c0_23, %c0_24], %30 {strides = array<i32>} : memref<32x128xf32, #tpu.memory_space<vmem>>, vector<32x128xf32>,
    return
  }
  func.func @transform_0(%arg0: i32) -> (i32, i32) {
    %c0_i32 = arith.constant 0 : i32
    %c0_i32_0 = arith.constant 0 : i32
    return %arg0, %c0_i32 : i32, i32
  }
  func.func @transform_1(%arg0: i32) -> (i32, i32) {
    %c0_i32 = arith.constant 0 : i32
    %c0_i32_0 = arith.constant 0 : i32
    %c0_i32_1 = arith.constant 0 : i32
    return %c0_i32, %c0_i32_0 : i32, i32
  }
  func.func @transform_2(%arg0: i32) -> (i32, i32) {
    %c0_i32 = arith.constant 0 : i32
    %c0_i32_0 = arith.constant 0 : i32
    %c0_i32_1 = arith.constant 0 : i32
    return %c0_i32, %c0_i32_0 : i32, i32
  }
  func.func @transform_3(%arg0: i32) -> (i32, i32) {
    %c0_i32 = arith.constant 0 : i32
    %c0_i32_0 = arith.constant 0 : i32
    %c0_i32_1 = arith.constant 0 : i32
    return %c0_i32, %c0_i32_0 : i32, i32
  }
  func.func @transform_4(%arg0: i32) -> (i32, i32) {
    %c0_i32 = arith.constant 0 : i32
    %c0_i32_0 = arith.constant 0 : i32
    %c0_i32_1 = arith.constant 0 : i32
    return %c0_i32, %c0_i32_0 : i32, i32
  }
  func.func @transform_5(%arg0: i32) -> (i32, i32) {
    %c0_i32 = arith.constant 0 : i32
    %c0_i32_0 = arith.constant 0 : i32
    %c0_i32_1 = arith.constant 0 : i32
    return %c0_i32, %c0_i32_0 : i32, i32
  }
  func.func @transform_6(%arg0: i32) -> (i32, i32) {
    %c0_i32 = arith.constant 0 : i32
    %c0_i32_0 = arith.constant 0 : i32
    %c0_i32_1 = arith.constant 0 : i32
    return %c0_i32, %c0_i32_0 : i32, i32
  }
  func.func @transform_7(%arg0: i32) -> (i32, i32) {
    %c0_i32 = arith.constant 0 : i32
    %c0_i32_0 = arith.constant 0 : i32
    %c0_i32_1 = arith.constant 0 : i32
    return %c0_i32, %c0_i32_0 : i32, i32
  }
  func.func @transform_8(%arg0: i32) -> (i32, i32) {
    %c0_i32 = arith.constant 0 : i32
    %c0_i32_0 = arith.constant 0 : i32
    %c0_i32_1 = arith.constant 0 : i32
    return %c0_i32, %c0_i32_0 : i32, i32
  }
  func.func @transform_9(%arg0: i32) -> (i32, i32) {
    %c0_i32 = arith.constant 0 : i32
    %c0_i32_0 = arith.constant 0 : i32
    return %arg0, %c0_i32 : i32, i32
  }
}

</mosaic_0001>

<bundles_post_ra>
// kernel: _dqn_forward_impl.1
= control target key start
LH: loop header
LB: loop body
LE: loop exit
PB: predicated region body
PF: predicated region fallthrough
CT: control target
= control target key end

     0   :  { %s1750_s30 = smov 0   ;;  %s2264_s0 = inlined_call_operand.vmem [shape: f32[96,32], index: 0, kind: input, shape index: {}]   ;;  %s2265_s1 = inlined_call_operand.vmem [shape: bf16[32,256], index: 1, kind: input, shape index: {}]   ;;  %s2266_s2 = inlined_call_operand.vmem [shape: f32[1,256], index: 2, kind: input, shape index: {}]   ;;  %s2267_s3 = inlined_call_operand.vmem [shape: bf16[256,256], index: 3, kind: input, shape index: {}]   ;;  %s2268_s4 = inlined_call_operand.vmem [shape: f32[1,256], index: 4, kind: input, shape index: {}]   ;;  %s2269_s5 = inlined_call_operand.vmem [shape: bf16[256,256], index: 5, kind: input, shape index: {}]   ;;  %s2270_s6 = inlined_call_operand.vmem [shape: f32[1,256], index: 6, kind: input, shape index: {}]   ;;  %s2271_s7 = inlined_call_operand.vmem [shape: bf16[256,128], index: 7, kind: input, shape index: {}]   ;;  %s2272_s8 = inlined_call_operand.vmem [shape: f32[1,128], index: 8, kind: input, shape index: {}]   ;;  %s2273_s9 = inlined_call_operand.vmem [shape: f32[96,128], index: 9, kind: output, shape index: {}]  }
   0x1 LB: > { %s1232_s10 = sadd.s32 4294967295, %s1698_s30   ;;  %p1236_p0 = scmp.ge.s32.totalorder %s1698_s30, 1  ;;  %s1698_s30 = sphi %s1750_s30, %s19_s30  }
   0x2   : > { %p288_p1 = scmp.lt.s32.totalorder %s1698_s30, 4 }
   0x4   : > { %p289_p2 = pnand %p1236_p0, %p288_p1 }
   0x5   : > { %s1237_s27 = sshll.u32 (!%p289_p2), %s1232_s10, 2 }
   0x6   : > { %292 = sbr.rel (%p289_p2) target bundleno = 620 (0x26c), region = 56  ;;  %p325_p3 = scmp.lt.s32.totalorder (!%p289_p2), %s1237_s27, 11 }
   0xb   : > { %v1251_v0 = vld [vmem:[%s2265_s1 + $0x10] sm:$0xf]  ;;  %v1586_v1 = vld [vmem:[%s2265_s1 + $0x14] sm:$0xf0]  ;;  %v1585_v2 = vld [vmem:[%s2265_s1 + $0x14] sm:$0xf] }
   0xc   : > { %v1252_v3 = vor.u32 %v1586_v1, %v1251_v0  ;;  %v1253_v4 = vld [vmem:[%s2265_s1 + $0x18] sm:$0xf0]  ;;  %v1243_v5 = vld [vmem:[%s2265_s1] sm:$0xf]  ;;  %v1584_v6 = vld [vmem:[%s2265_s1 + $0x4] sm:$0xf0] }
   0xd   : > { %v1256_v7 = vor.u32 %v1585_v2, %v1253_v4  ;;  %v1583_v8 = vld [vmem:[%s2265_s1 + $0x4] sm:$0xf]  ;;  %v1245_v9 = vld [vmem:[%s2265_s1 + $0x8] sm:$0xf0]  ;;  %v1244_v10 = vor.u32 %v1584_v6, %v1243_v5  ;;  %v1319_v11 = vld [vmem:[%s2267_s3 + $0x70] sm:$0xf] }
   0xe   : > { %386 = vmatpush.bf16.msra.mxu0 %v1252_v3  ;;  %v1602_v12 = vld [vmem:[%s2267_s3 + $0x74] sm:$0xf0]  ;;  %v1248_v13 = vor.u32 %v1583_v8, %v1245_v9  ;;  %v1383_v15 = vld [vmem:[%s2267_s3 + $0xf0] sm:$0xf]  ;;  %v1601_v17 = vld [vmem:[%s2267_s3 + $0x74] sm:$0xf] }
   0xf   : > { %405 = vmatpush.bf16.msra.mxu1 %v1256_v7  ;;  %v1320_v14 = vor.u32 %v1602_v12, %v1319_v11  ;;  %v1618_v16 = vld [vmem:[%s2267_s3 + $0xf4] sm:$0xf0]  ;;  %s2275_s27 = smov (!%p325_p3, %s1237_s27), 11  ;;  %v1321_v19 = vld [vmem:[%s2267_s3 + $0x78] sm:$0xf0]  ;;  %vm373_vm0 = vcmask 261120  }
  0x10   : > { %v1384_v18 = vor.u32 %v1618_v16, %v1383_v15  ;;  %v1617_v20 = vld [vmem:[%s2267_s3 + $0xf4] sm:$0xf]  ;;  %v1324_v21 = vor.u32 %v1601_v17, %v1321_v19  ;;  %v1385_v22 = vld [vmem:[%s2267_s3 + $0xf8] sm:$0xf0]  ;;  %v1311_v23 = vld [vmem:[%s2267_s3 + $0x60] sm:$0xf] }
  0x11   : > { %628 = vmatpush.bf16.msra.mxu2 %v1320_v14  ;;  %v1600_v24 = vld [vmem:[%s2267_s3 + $0x64] sm:$0xf0]  ;;  %s1238_s29 = sshll.u32 %s2275_s27, 3  ;;  %v1388_v25 = vor.u32 %v1617_v20, %v1385_v22  ;;  %v1375_v27 = vld [vmem:[%s2267_s3 + $0xe0] sm:$0xf] }
  0x12   : > { %387 = vmatpush.bf16.msra.mxu0 %v1244_v10  ;;  %647 = vmatpush.bf16.msra.mxu3 %v1384_v18  ;;  %v1312_v26 = vor.u32 %v1600_v24, %v1311_v23  ;;  %v1616_v28 = vld [vmem:[%s2267_s3 + $0xe4] sm:$0xf0]  ;;  %s1826_s16 = scalar_lea.vmem %s2264_s0, %s1238_s29  ;;  %v1599_v30 = vld [vmem:[%s2267_s3 + $0x64] sm:$0xf]  ;;  %v1313_v31 = vld [vmem:[%s2267_s3 + $0x68] sm:$0xf0]  ;;  %s334_s23 = scalar_lea.vmem %s2273_s9, %s1238_s29 }
  0x13   : > { %406 = vmatpush.bf16.msra.mxu1 %v1248_v13  ;;  %v1376_v29 = vor.u32 %v1616_v28, %v1375_v27  ;;  %v1615_v32 = vld [vmem:[%s2267_s3 + $0xe4] sm:$0xf]  ;;  %v338_v34 = vld [vmem:[%s1826_s16 + $0x8] sm:$0xff]  ;;  %v1316_v35 = vor.u32 %v1599_v30, %v1313_v31  ;;  %v1303_v38 = vld [vmem:[%s2267_s3 + $0x50] sm:$0xf] }
  0x14   : > { %v337_v33 = vld [vmem:[%s1826_s16] sm:$0xff]  ;;  %v1377_v37 = vld [vmem:[%s2267_s3 + $0xe8] sm:$0xf0]  ;;  %v1598_v40 = vld [vmem:[%s2267_s3 + $0x54] sm:$0xf0] }
  0x15   : > { %v341_v36 = vpack.c.bf16 %v338_v34, %v337_v33  ;;  %629 = vmatpush.bf16.msra.mxu2 %v1312_v26  ;;  %v1380_v39 = vor.u32 %v1615_v32, %v1377_v37  ;;  %v1367_v41 = vld [vmem:[%s2267_s3 + $0xd0] sm:$0xf]  ;;  %v1614_v42 = vld [vmem:[%s2267_s3 + $0xd4] sm:$0xf0]  ;;  %v1304_v43 = vor.u32 %v1598_v40, %v1303_v38  ;;  %v1597_v45 = vld [vmem:[%s2267_s3 + $0x54] sm:$0xf] }
  0x16   : > { %666 = vmatpush.bf16.msrb.mxu0 %v1324_v21  ;;  %648 = vmatpush.bf16.msra.mxu3 %v1376_v29  ;;  %v1368_v44 = vor.u32 %v1614_v42, %v1367_v41  ;;  %v1305_v46 = vld [vmem:[%s2267_s3 + $0x58] sm:$0xf0]  ;;  %v1613_v47 = vld [vmem:[%s2267_s3 + $0xd4] sm:$0xf]  ;;  %v1295_v50 = vld [vmem:[%s2267_s3 + $0x40] sm:$0xf] }
  0x17   : > { %685 = vmatpush.bf16.msrb.mxu1 %v1388_v25  ;;  %1257 = vmatmul.msk.bf16.vlgmr.msra.gmra.mxu0 %vm373_vm0, %v341_v36  ;;  %v1308_v48 = vor.u32 %v1597_v45, %v1305_v46  ;;  %v1369_v49 = vld [vmem:[%s2267_s3 + $0xd8] sm:$0xf0]  ;;  %v1596_v51 = vld [vmem:[%s2267_s3 + $0x44] sm:$0xf0]  ;;  %v1359_v54 = vld [vmem:[%s2267_s3 + $0xc0] sm:$0xf] }
  0x18   : > { %1259 = vmatmul.msk.bf16.vlgmr.msra.gmra.mxu1 %vm373_vm0, %v341_v36  ;;  %v1372_v52 = vor.u32 %v1613_v47, %v1369_v49  ;;  %v1296_v53 = vor.u32 %v1596_v51, %v1295_v50  ;;  %v1612_v55 = vld [vmem:[%s2267_s3 + $0xc4] sm:$0xf0]  ;;  %v1595_v56 = vld [vmem:[%s2267_s3 + $0x44] sm:$0xf]  ;;  %v1297_v58 = vld [vmem:[%s2267_s3 + $0x48] sm:$0xf0] }
  0x19   : > { %630 = vmatpush.bf16.msra.mxu2 %v1304_v43  ;;  %v1360_v57 = vor.u32 %v1612_v55, %v1359_v54  ;;  %v1611_v59 = vld [vmem:[%s2267_s3 + $0xc4] sm:$0xf]  ;;  %v1361_v60 = vld [vmem:[%s2267_s3 + $0xc8] sm:$0xf0]  ;;  %v1300_v61 = vor.u32 %v1595_v56, %v1297_v58  ;;  %v339_v63 = vld [vmem:[%s1826_s16 + $0x10] sm:$0xff] }
  0x1a   : > { %667 = vmatpush.bf16.msrb.mxu0 %v1316_v35  ;;  %649 = vmatpush.bf16.msra.mxu3 %v1368_v44  ;;  %v1364_v62 = vor.u32 %v1611_v59, %v1361_v60  ;;  %v340_v0 = vld [vmem:[%s1826_s16 + $0x18] sm:$0xff]  ;;  %v1287_v2 = vld [vmem:[%s2267_s3 + $0x30] sm:$0xf]  ;;  %v1593_v7 = vld [vmem:[%s2267_s3 + $0x34] sm:$0xf] }
  0x1b   : > { %686 = vmatpush.bf16.msrb.mxu1 %v1380_v39  ;;  %v342_v1 = vpack.c.bf16 %v340_v0, %v339_v63  ;;  %v1594_v3 = vld [vmem:[%s2267_s3 + $0x34] sm:$0xf0]  ;;  %v1351_v4 = vld [vmem:[%s2267_s3 + $0xb0] sm:$0xf]  ;;  %v1289_v8 = vld [vmem:[%s2267_s3 + $0x38] sm:$0xf0] }
  0x1c   : > { %v1288_v5 = vor.u32 %v1594_v3, %v1287_v2  ;;  %v1610_v6 = vld [vmem:[%s2267_s3 + $0xb4] sm:$0xf0]  ;;  %v1292_v10 = vor.u32 %v1593_v7, %v1289_v8  ;;  %v1609_v11 = vld [vmem:[%s2267_s3 + $0xb4] sm:$0xf]  ;;  %v1353_v12 = vld [vmem:[%s2267_s3 + $0xb8] sm:$0xf0] }
  0x1d   : > { %631 = vmatpush.bf16.msra.mxu2 %v1296_v53  ;;  %v1352_v9 = vor.u32 %v1610_v6, %v1351_v4  ;;  %v1356_v13 = vor.u32 %v1609_v11, %v1353_v12  ;;  %v1279_v14 = vld [vmem:[%s2267_s3 + $0x20] sm:$0xf]  ;;  %v1592_v15 = vld [vmem:[%s2267_s3 + $0x24] sm:$0xf0]  ;;  %v1591_v19 = vld [vmem:[%s2267_s3 + $0x24] sm:$0xf] }
  0x1e   : > { %668 = vmatpush.bf16.msrb.mxu0 %v1308_v48  ;;  %650 = vmatpush.bf16.msra.mxu3 %v1360_v57  ;;  %v1280_v16 = vor.u32 %v1592_v15, %v1279_v14  ;;  %v1343_v17 = vld [vmem:[%s2267_s3 + $0xa0] sm:$0xf]  ;;  %v1608_v18 = vld [vmem:[%s2267_s3 + $0xa4] sm:$0xf0]  ;;  %v1281_v21 = vld [vmem:[%s2267_s3 + $0x28] sm:$0xf0] }
  0x1f   : > { %687 = vmatpush.bf16.msrb.mxu1 %v1372_v52  ;;  %v1344_v20 = vor.u32 %v1608_v18, %v1343_v17  ;;  %v1607_v22 = vld [vmem:[%s2267_s3 + $0xa4] sm:$0xf]  ;;  %v1345_v23 = vld [vmem:[%s2267_s3 + $0xa8] sm:$0xf0]  ;;  %v1284_v24 = vor.u32 %v1591_v19, %v1281_v21  ;;  %v1271_v26 = vld [vmem:[%s2267_s3 + $0x10] sm:$0xf] }
  0x20   : > { %v1348_v25 = vor.u32 %v1607_v22, %v1345_v23  ;;  %v1590_v27 = vld [vmem:[%s2267_s3 + $0x14] sm:$0xf0]  ;;  %v1335_v28 = vld [vmem:[%s2267_s3 + $0x90] sm:$0xf]  ;;  %v1589_v31 = vld [vmem:[%s2267_s3 + $0x14] sm:$0xf] }
  0x21   : > { %632 = vmatpush.bf16.msra.mxu2 %v1288_v5  ;;  %v1272_v29 = vor.u32 %v1590_v27, %v1271_v26  ;;  %v1606_v30 = vld [vmem:[%s2267_s3 + $0x94] sm:$0xf0]  ;;  %v1273_v32 = vld [vmem:[%s2267_s3 + $0x18] sm:$0xf0]  ;;  %v1605_v35 = vld [vmem:[%s2267_s3 + $0x94] sm:$0xf] }
  0x22   : > { %669 = vmatpush.bf16.msrb.mxu0 %v1300_v61  ;;  %651 = vmatpush.bf16.msra.mxu3 %v1352_v9  ;;  %v1336_v33 = vor.u32 %v1606_v30, %v1335_v28  ;;  %v1276_v34 = vor.u32 %v1589_v31, %v1273_v32  ;;  %v1337_v36 = vld [vmem:[%s2267_s3 + $0x98] sm:$0xf0]  ;;  %v1263_v38 = vld [vmem:[%s2267_s3] sm:$0xf]  ;;  %v1588_v39 = vld [vmem:[%s2267_s3 + $0x4] sm:$0xf0] }
  0x23   : > { %688 = vmatpush.bf16.msrb.mxu1 %v1364_v62  ;;  %v1340_v37 = vor.u32 %v1605_v35, %v1337_v36  ;;  %v1327_v40 = vld [vmem:[%s2267_s3 + $0x80] sm:$0xf]  ;;  %v1264_v41 = vor.u32 %v1588_v39, %v1263_v38  ;;  %v1604_v42 = vld [vmem:[%s2267_s3 + $0x84] sm:$0xf0]  ;;  %v1587_v43 = vld [vmem:[%s2267_s3 + $0x4] sm:$0xf] }
  0x24   : > { %v1265_v44 = vld [vmem:[%s2267_s3 + $0x8] sm:$0xf0]  ;;  %v1328_v45 = vor.u32 %v1604_v42, %v1327_v40  ;;  %v1603_v47 = vld [vmem:[%s2267_s3 + $0x84] sm:$0xf]  ;;  %v347_v50 = vld [vmem:[%s2266_s2] sm:$0x3] }
  0x25   : > { %633 = vmatpush.bf16.msra.mxu2 %v1280_v16  ;;  %v1268_v46 = vor.u32 %v1587_v43, %v1265_v44  ;;  %v1329_v48 = vld [vmem:[%s2267_s3 + $0x88] sm:$0xf0]  ;;  %v1995_v51 = vperm.slane %v347_v50, 0  ;;  %v1997_v52 = vperm.slane %v347_v50, 1  ;;  %v1511_v55 = vld [vmem:[%s2269_s5 + $0xf0] sm:$0xf] }
  0x26   : > { %670 = vmatpush.bf16.msrb.mxu0 %v1292_v10  ;;  %652 = vmatpush.bf16.msra.mxu3 %v1344_v20  ;;  %v1332_v49 = vor.u32 %v1603_v47, %v1329_v48  ;;  %v1650_v56 = vld [vmem:[%s2269_s5 + $0xf4] sm:$0xf0]  ;;  %v1649_v57 = vld [vmem:[%s2269_s5 + $0xf4] sm:$0xf]  ;;  %v1513_v59 = vld [vmem:[%s2269_s5 + $0xf8] sm:$0xf0] }
  0x27   : > { %1258 = vmatmul.msk.bf16.gmra.mxu0 %vm373_vm0, %v342_v1  ;;  %689 = vmatpush.bf16.msrb.mxu1 %v1356_v13  ;;  %v1512_v58 = vor.u32 %v1650_v56, %v1511_v55  ;;  %v1503_v60 = vld [vmem:[%s2269_s5 + $0xe0] sm:$0xf]  ;;  %v1648_v61 = vld [vmem:[%s2269_s5 + $0xe4] sm:$0xf0]  ;;  %v1516_v62 = vor.u32 %v1649_v57, %v1513_v59  ;;  %v1647_v63 = vld [vmem:[%s2269_s5 + $0xe4] sm:$0xf] }
  0x28   : > { %1260 = vmatmul.msk.bf16.gmra.mxu1 %vm373_vm0, %v342_v1  ;;  %v1505_v0 = vld [vmem:[%s2269_s5 + $0xe8] sm:$0xf0]  ;;  %v1447_v1 = vld [vmem:[%s2269_s5 + $0x70] sm:$0xf]  ;;  %v1504_v2 = vor.u32 %v1648_v61, %v1503_v60  ;;  %v1634_v3 = vld [vmem:[%s2269_s5 + $0x74] sm:$0xf0] }
  0x29   : > { %634 = vmatpush.bf16.msra.mxu2 %v1272_v29  ;;  %v1633_v4 = vld [vmem:[%s2269_s5 + $0x74] sm:$0xf]  ;;  %v1508_v5 = vor.u32 %v1647_v63, %v1505_v0  ;;  %v1448_v6 = vor.u32 %v1634_v3, %v1447_v1  ;;  %v1449_v7 = vld [vmem:[%s2269_s5 + $0x78] sm:$0xf0]  ;;  %v1495_v8 = vld [vmem:[%s2269_s5 + $0xd0] sm:$0xf] }
  0x2a   : > { %671 = vmatpush.bf16.msrb.mxu0 %v1284_v24  ;;  %653 = vmatpush.bf16.msra.mxu3 %v1336_v33  ;;  %v1646_v9 = vld [vmem:[%s2269_s5 + $0xd4] sm:$0xf0]  ;;  %v1452_v10 = vor.u32 %v1633_v4, %v1449_v7  ;;  %v1645_v11 = vld [vmem:[%s2269_s5 + $0xd4] sm:$0xf]  ;;  %v1497_v12 = vld [vmem:[%s2269_s5 + $0xd8] sm:$0xf0] }
  0x2b   : > { %690 = vmatpush.bf16.msrb.mxu1 %v1348_v25  ;;  %v1439_v13 = vld [vmem:[%s2269_s5 + $0x60] sm:$0xf]  ;;  %v1632_v16 = vld [vmem:[%s2269_s5 + $0x64] sm:$0xf0]  ;;  %v1631_v17 = vld [vmem:[%s2269_s5 + $0x64] sm:$0xf]  ;;  %v1496_v19 = vor.u32 %v1646_v9, %v1495_v8  ;;  %v1500_v24 = vor.u32 %v1645_v11, %v1497_v12 }
  0x2c   : > { %v1441_v18 = vld [vmem:[%s2269_s5 + $0x68] sm:$0xf0]  ;;  %v1440_v20 = vor.u32 %v1632_v16, %v1439_v13  ;;  %v1431_v25 = vld [vmem:[%s2269_s5 + $0x50] sm:$0xf]  ;;  %v1630_v26 = vld [vmem:[%s2269_s5 + $0x54] sm:$0xf0] }
  0x2d   : > { %635 = vmatpush.bf16.msra.mxu2 %v1264_v41  ;;  %v1444_v21 = vor.u32 %v1631_v17, %v1441_v18  ;;  %v1487_v29 = vld [vmem:[%s2269_s5 + $0xc0] sm:$0xf]  ;;  %v1644_v30 = vld [vmem:[%s2269_s5 + $0xc4] sm:$0xf0]  ;;  %v1643_v31 = vld [vmem:[%s2269_s5 + $0xc4] sm:$0xf]  ;;  %v1432_v33 = vor.u32 %v1630_v26, %v1431_v25 }
  0x2e   : > { %672 = vmatpush.bf16.msrb.mxu0 %v1276_v34  ;;  %654 = vmatpush.bf16.msra.mxu3 %v1328_v45  ;;  %v1489_v32 = vld [vmem:[%s2269_s5 + $0xc8] sm:$0xf0]  ;;  %v1488_v40 = vor.u32 %v1644_v30, %v1487_v29  ;;  %v1642_v60 = vld [vmem:[%s2269_s5 + $0xb4] sm:$0xf0]  ;;  %v1641_v61 = vld [vmem:[%s2269_s5 + $0xb4] sm:$0xf] }
  0x2f   : > { %691 = vmatpush.bf16.msrb.mxu1 %v1340_v37  ;;  %v1492_v41 = vor.u32 %v1643_v31, %v1489_v32  ;;  %v1481_v63 = vld [vmem:[%s2269_s5 + $0xb8] sm:$0xf0]  ;;  %v1423_v1 = vld [vmem:[%s2269_s5 + $0x40] sm:$0xf]  ;;  %v1627_v3 = vld [vmem:[%s2269_s5 + $0x44] sm:$0xf] }
  0x30   : > { %v1484_v0 = vor.u32 %v1641_v61, %v1481_v63  ;;  %v1471_v7 = vld [vmem:[%s2269_s5 + $0xa0] sm:$0xf]  ;;  %v1640_v8 = vld [vmem:[%s2269_s5 + $0xa4] sm:$0xf0]  ;;  %v1639_v9 = vld [vmem:[%s2269_s5 + $0xa4] sm:$0xf] }
  0x31   : > { %914 = vmatpush.bf16.msrb.mxu2 %v1448_v6  ;;  %v1473_v11 = vld [vmem:[%s2269_s5 + $0xa8] sm:$0xf0]  ;;  %v1415_v13 = vld [vmem:[%s2269_s5 + $0x30] sm:$0xf]  ;;  %v1625_v16 = vld [vmem:[%s2269_s5 + $0x34] sm:$0xf] }
  0x32   : > { %673 = vmatpush.bf16.msrb.mxu0 %v1268_v46  ;;  %933 = vmatpush.bf16.msrb.mxu3 %v1512_v58  ;;  %v1629_v58 = vld [vmem:[%s2269_s5 + $0x54] sm:$0xf]  ;;  %v1476_v12 = vor.u32 %v1639_v9, %v1473_v11  ;;  %v1417_v17 = vld [vmem:[%s2269_s5 + $0x38] sm:$0xf0]  ;;  %v1407_v25 = vld [vmem:[%s2269_s5 + $0x20] sm:$0xf] }
  0x33   : > { %692 = vmatpush.bf16.msrb.mxu1 %v1332_v49  ;;  %v1420_v18 = vor.u32 %v1625_v16, %v1417_v17  ;;  %v1624_v26 = vld [vmem:[%s2269_s5 + $0x24] sm:$0xf0]  ;;  %v1409_v29 = vld [vmem:[%s2269_s5 + $0x28] sm:$0xf0]  ;;  %v1455_v31 = vld [vmem:[%s2269_s5 + $0x80] sm:$0xf] }
  0x34   : > { %v1636_v32 = vld [vmem:[%s2269_s5 + $0x84] sm:$0xf0]  ;;  %v1665_v61 = vld [vmem:[%s2271_s7 + $0x70] sm:$0xff] }
  0x35   : > { %915 = vmatpush.bf16.msrb.mxu2 %v1440_v20  ;;  %v1638_v20 = vld [vmem:[%s2269_s5 + $0x94] sm:$0xf0] }
  0x36   : > { %934 = vmatpush.bf16.msrb.mxu3 %v1504_v2  ;;  %952 = vmatpush.bf16.msra.mxu0 %v1452_v10  ;;  %v1628_v2 = vld [vmem:[%s2269_s5 + $0x44] sm:$0xf0]  ;;  %v1472_v10 = vor.u32 %v1640_v8, %v1471_v7 }
  0x37   : > { %971 = vmatpush.bf16.msra.mxu1 %v1516_v62  ;;  %v1424_v4 = vor.u32 %v1628_v2, %v1423_v1 }
  0x39   : > { %916 = vmatpush.bf16.msrb.mxu2 %v1432_v33  ;;  %v1635_v33 = vld [vmem:[%s2269_s5 + $0x84] sm:$0xf] }
  0x3a   : > { %935 = vmatpush.bf16.msrb.mxu3 %v1496_v19  ;;  %953 = vmatpush.bf16.msra.mxu0 %v1444_v21  ;;  %v1463_v19 = vld [vmem:[%s2269_s5 + $0x90] sm:$0xf]  ;;  %v1637_v21 = vld [vmem:[%s2269_s5 + $0x94] sm:$0xf] }
  0x3b   : > { %972 = vmatpush.bf16.msra.mxu1 %v1508_v5  ;;  %v1425_v5 = vld [vmem:[%s2269_s5 + $0x48] sm:$0xf0] }
  0x3c   : > { %v1428_v6 = vor.u32 %v1627_v3, %v1425_v5 }
  0x3d   : > { %917 = vmatpush.bf16.msrb.mxu2 %v1424_v4 }
  0x3e   : > { %936 = vmatpush.bf16.msrb.mxu3 %v1488_v40 }
  0x3f   : > { %973 = vmatpush.bf16.msra.mxu1 %v1500_v24 }
  0x43   : > { %974 = vmatpush.bf16.msra.mxu1 %v1492_v41  ;;  %v1401_v41 = vld [vmem:[%s2269_s5 + $0x18] sm:$0xf0] }
  0x47   : > { %975 = vmatpush.bf16.msra.mxu1 %v1484_v0 }
  0x4b   : > { %976 = vmatpush.bf16.msra.mxu1 %v1476_v12 }
  0x94   : > { %v389_v53 = vpop.f32.mrf.mxu0 }
  0x95   : > { %v408_v54 = vpop.f32.mrf.mxu1  ;;  %v390_v14 = vadd.f32 %v389_v53, %v1995_v51 }
  0x96   : > { %v409_v15 = vadd.f32 %v408_v54, %v1997_v52 }
  0x97   : > { %v418_v34 = vmax.f32 %v390_v14, 0.0  ;;  %v1626_v14 = vld [vmem:[%s2269_s5 + $0x34] sm:$0xf0] }
  0x98   : > { %v419_v35 = vmax.f32 %v409_v15, 0.0  ;;  %v1416_v15 = vor.u32 %v1626_v14, %v1415_v13 }
  0x9a   : > { %918 = vmatpush.bf16.msrb.mxu2 %v1416_v15 }
  0x9c   : > { %v391_v22 = vpop.f32.mrf.mxu0 }
  0x9d   : > { %v410_v23 = vpop.f32.mrf.mxu1  ;;  %v392_v27 = vadd.f32 %v391_v22, %v1995_v51  ;;  %v1464_v22 = vor.u32 %v1638_v20, %v1463_v19 }
  0x9e   : > { %v411_v28 = vadd.f32 %v410_v23, %v1997_v52  ;;  %v1465_v23 = vld [vmem:[%s2269_s5 + $0x98] sm:$0xf0] }
  0x9f   : > { %v420_v36 = vmax.f32 %v392_v27, 0.0  ;;  %v1468_v24 = vor.u32 %v1637_v21, %v1465_v23  ;;  %v1623_v27 = vld [vmem:[%s2269_s5 + $0x24] sm:$0xf] }
  0xa0   : > { %v421_v37 = vmax.f32 %v411_v28, 0.0  ;;  %v1408_v28 = vor.u32 %v1624_v26, %v1407_v25  ;;  %v1412_v30 = vor.u32 %v1623_v27, %v1409_v29 }
  0xa1   : > { %v426_v38 = vpack.c.bf16 %v420_v36, %v418_v34  ;;  %977 = vmatpush.bf16.msra.mxu1 %v1468_v24  ;;  %v1456_v34 = vor.u32 %v1636_v32, %v1455_v31 }
  0xa2   : > { %v427_v39 = vpack.c.bf16 %v421_v37, %v419_v35  ;;  %919 = vmatpush.bf16.msrb.mxu2 %v1408_v28  ;;  %v1457_v35 = vld [vmem:[%s2269_s5 + $0x88] sm:$0xf0]  ;;  %v1399_v37 = vld [vmem:[%s2269_s5 + $0x10] sm:$0xf] }
  0xa3   : > { %636 = vmatmul.bf16.vlgmr.msra.gmra.mxu2 %v426_v38  ;;  %674 = vmatmul.bf16.vlgmr.msrb.gmra.mxu0 %v426_v38  ;;  %v1460_v36 = vor.u32 %v1635_v33, %v1457_v35  ;;  %v1622_v38 = vld [vmem:[%s2269_s5 + $0x14] sm:$0xf0]  ;;  %v1664_v35 = vld [vmem:[%s2271_s7 + $0x68] sm:$0xff] }
  0xa4   : > { %655 = vmatmul.bf16.vlgmr.msra.gmra.mxu3 %v427_v39  ;;  %693 = vmatmul.bf16.vlgmr.msrb.gmra.mxu1 %v427_v39  ;;  %v394_v42 = vpop.f32.mrf.mxu0  ;;  %v1621_v39 = vld [vmem:[%s2269_s5 + $0x14] sm:$0xf]  ;;  %v1400_v40 = vor.u32 %v1622_v38, %v1399_v37  ;;  %v1663_v37 = vld [vmem:[%s2271_s7 + $0x60] sm:$0xff]  ;;  %v1656_v38 = vld [vmem:[%s2271_s7 + $0x28] sm:$0xff] }
  0xa5   : > { %v413_v43 = vpop.f32.mrf.mxu1  ;;  %v395_v44 = vadd.f32 %v394_v42, %v1995_v51  ;;  %978 = vmatpush.bf16.msra.mxu1 %v1460_v36  ;;  %v1404_v42 = vor.u32 %v1621_v39, %v1401_v41  ;;  %v1657_v36 = vld [vmem:[%s2271_s7 + $0x30] sm:$0xff]  ;;  %v1662_v39 = vld [vmem:[%s2271_s7 + $0x58] sm:$0xff] }
  0xa6   : > { %v414_v45 = vadd.f32 %v413_v43, %v1997_v52  ;;  %920 = vmatpush.bf16.msrb.mxu2 %v1400_v40  ;;  %v1391_v43 = vld [vmem:[%s2269_s5] sm:$0xf]  ;;  %v1661_v41 = vld [vmem:[%s2271_s7 + $0x50] sm:$0xff] }
  0xa7   : > { %v422_v50 = vmax.f32 %v395_v44, 0.0  ;;  %v1620_v44 = vld [vmem:[%s2269_s5 + $0x4] sm:$0xf0]  ;;  %v1655_v40 = vld [vmem:[%s2271_s7 + $0x20] sm:$0xff] }
  0xa8   : > { %v423_v53 = vmax.f32 %v414_v45, 0.0  ;;  %v1619_v45 = vld [vmem:[%s2269_s5 + $0x4] sm:$0xf] }
  0xac   : > { %v396_v46 = vpop.f32.mrf.mxu0 }
  0xad   : > { %v415_v47 = vpop.f32.mrf.mxu1  ;;  %v397_v48 = vadd.f32 %v396_v46, %v1995_v51  ;;  %v1433_v51 = vld [vmem:[%s2269_s5 + $0x58] sm:$0xf0]  ;;  %v1392_v46 = vor.u32 %v1620_v44, %v1391_v43  ;;  %v1660_v43 = vld [vmem:[%s2271_s7 + $0x48] sm:$0xff]  ;;  %v1653_v44 = vld [vmem:[%s2271_s7 + $0x10] sm:$0xff] }
  0xae   : > { %v416_v49 = vadd.f32 %v415_v47, %v1997_v52  ;;  %v1436_v59 = vor.u32 %v1629_v58, %v1433_v51  ;;  %v1479_v52 = vld [vmem:[%s2269_s5 + $0xb0] sm:$0xf]  ;;  %v1393_v47 = vld [vmem:[%s2269_s5 + $0x8] sm:$0xf0]  ;;  %v1666_v51 = vld [vmem:[%s2271_s7 + $0x78] sm:$0xff] }
  0xaf   : > { %v424_v54 = vmax.f32 %v397_v48, 0.0  ;;  %v1480_v62 = vor.u32 %v1642_v60, %v1479_v52  ;;  %v1396_v48 = vor.u32 %v1619_v45, %v1393_v47  ;;  %921 = vmatpush.bf16.msrb.mxu2 %v1392_v46  ;;  %1153 = vmatpush.bf16.msrb.mxu1 %v1666_v51  ;;  %v1659_v45 = vld [vmem:[%s2271_s7 + $0x40] sm:$0xff]  ;;  %v1652_v46 = vld [vmem:[%s2271_s7 + $0x8] sm:$0xff] }
  0xb0   : > { %v425_v55 = vmax.f32 %v416_v49, 0.0  ;;  %954 = vmatpush.bf16.msra.mxu0 %v1436_v59  ;;  %v462_v49 = vld [vmem:[%s2268_s4] sm:$0x3]  ;;  %v1658_v59 = vld [vmem:[%s2271_s7 + $0x38] sm:$0xff] }
  0xb1   : > { %v428_v56 = vpack.c.bf16 %v424_v54, %v422_v50  ;;  %937 = vmatpush.bf16.msrb.mxu3 %v1480_v62  ;;  %v465_v54 = vperm.slane %v462_v49, 1  ;;  %v464_v58 = vperm.slane %v462_v49, 0  ;;  %v1651_v47 = vld [vmem:[%s2271_s7] sm:$0xff] }
  0xb2   : > { %v429_v57 = vpack.c.bf16 %v425_v55, %v423_v53  ;;  %v748_v49 = vld [vmem:[%s2270_s6] sm:$0x3] }
  0xb3   : > { %641 = vmatmul.bf16.gmra.mxu2 %v428_v56  ;;  %679 = vmatmul.bf16.gmra.mxu0 %v428_v56 }
  0xb4   : > { %660 = vmatmul.bf16.gmra.mxu3 %v429_v57  ;;  %698 = vmatmul.bf16.gmra.mxu1 %v429_v57 }
  0xb5   : > { %955 = vmatpush.bf16.msra.mxu0 %v1428_v6  ;;  %938 = vmatpush.bf16.msrb.mxu3 %v1472_v10 }
  0xb6   : > { %1667 = vmatpush.bf16.msra.mxu2 %v1658_v59  ;;  %1154 = vmatpush.bf16.msrb.mxu1 %v1665_v61 }
  0xb9   : > { %956 = vmatpush.bf16.msra.mxu0 %v1420_v18  ;;  %939 = vmatpush.bf16.msrb.mxu3 %v1464_v22 }
  0xba   : > { %1155 = vmatpush.bf16.msrb.mxu1 %v1664_v35  ;;  %1668 = vmatpush.bf16.msra.mxu2 %v1657_v36 }
  0xbd   : > { %957 = vmatpush.bf16.msra.mxu0 %v1412_v30  ;;  %940 = vmatpush.bf16.msrb.mxu3 %v1456_v34 }
  0xbe   : > { %1156 = vmatpush.bf16.msrb.mxu1 %v1663_v37  ;;  %1669 = vmatpush.bf16.msra.mxu2 %v1656_v38 }
  0xc1   : > { %958 = vmatpush.bf16.msra.mxu0 %v1404_v42  ;;  %1675 = vmatpush.bf16.msra.mxu3 %v1666_v51  ;;  %v1654_v42 = vld [vmem:[%s2271_s7 + $0x18] sm:$0xff] }
  0xc2   : > { %1157 = vmatpush.bf16.msrb.mxu1 %v1662_v39  ;;  %1670 = vmatpush.bf16.msra.mxu2 %v1655_v40 }
  0xc5   : > { %959 = vmatpush.bf16.msra.mxu0 %v1396_v48  ;;  %1676 = vmatpush.bf16.msra.mxu3 %v1665_v61 }
  0xc6   : > { %1158 = vmatpush.bf16.msrb.mxu1 %v1661_v41  ;;  %1671 = vmatpush.bf16.msra.mxu2 %v1654_v42 }
  0xc9   : > { %1134 = vmatpush.bf16.msrb.mxu0 %v1658_v59  ;;  %1677 = vmatpush.bf16.msra.mxu3 %v1664_v35 }
  0xca   : > { %1159 = vmatpush.bf16.msrb.mxu1 %v1660_v43  ;;  %1672 = vmatpush.bf16.msra.mxu2 %v1653_v44 }
  0xcd   : > { %1135 = vmatpush.bf16.msrb.mxu0 %v1657_v36  ;;  %1678 = vmatpush.bf16.msra.mxu3 %v1663_v37 }
  0xce   : > { %1160 = vmatpush.bf16.msrb.mxu1 %v1659_v45  ;;  %1673 = vmatpush.bf16.msra.mxu2 %v1652_v46 }
  0xd1   : > { %1136 = vmatpush.bf16.msrb.mxu0 %v1656_v38  ;;  %1679 = vmatpush.bf16.msra.mxu3 %v1662_v39 }
  0xd2   : > { %1674 = vmatpush.bf16.msra.mxu2 %v1651_v47 }
  0xd5   : > { %1137 = vmatpush.bf16.msrb.mxu0 %v1655_v40  ;;  %1680 = vmatpush.bf16.msra.mxu3 %v1661_v41 }
  0xd9   : > { %1138 = vmatpush.bf16.msrb.mxu0 %v1654_v42  ;;  %1681 = vmatpush.bf16.msra.mxu3 %v1660_v43 }
  0xdd   : > { %1139 = vmatpush.bf16.msrb.mxu0 %v1653_v44  ;;  %1682 = vmatpush.bf16.msra.mxu3 %v1659_v45 }
  0xe1   : > { %1140 = vmatpush.bf16.msrb.mxu0 %v1652_v46 }
  0xe5   : > { %1141 = vmatpush.bf16.msrb.mxu0 %v1651_v47 }
 0x120   : > { %v675_v50 = vpop.f32.mrf.mxu0 }
 0x121   : > { %v694_v53 = vpop.f32.mrf.mxu1  ;;  %v676_v55 = vadd.f32 %v675_v50, %v465_v54 }
 0x123   : > { %v695_v62 = vadd.f32 %v694_v53, %v676_v55  ;;  %v751_v53 = vperm.slane %v748_v49, 1 }
 0x125   : > { %v705_v2 = vmax.f32 %v695_v62, 0.0 }
 0x126   : > { %v637_v56 = vpop.f32.mrf.mxu2 }
 0x127   : > { %v656_v57 = vpop.f32.mrf.mxu3  ;;  %v638_v0 = vadd.f32 %v637_v56, %v464_v58 }
 0x128   : > { %v677_v52 = vpop.f32.mrf.mxu0 }
 0x129   : > { %v696_v60 = vpop.f32.mrf.mxu1  ;;  %v678_v63 = vadd.f32 %v677_v52, %v465_v54  ;;  %v657_v6 = vadd.f32 %v656_v57, %v638_v0 }
 0x12b   : > { %v697_v1 = vadd.f32 %v696_v60, %v678_v63  ;;  %v704_v12 = vmax.f32 %v657_v6, 0.0 }
 0x12d   : > { %v707_v3 = vmax.f32 %v697_v1, 0.0 }
 0x12e   : > { %v639_v4 = vpop.f32.mrf.mxu2 }
 0x12f   : > { %v658_v5 = vpop.f32.mrf.mxu3  ;;  %v640_v7 = vadd.f32 %v639_v4, %v464_v58  ;;  %v713_v8 = vpack.c.bf16 %v707_v3, %v705_v2 }
 0x130   : > { %v680_v10 = vpop.f32.mrf.mxu0 }
 0x131   : > { %v659_v9 = vadd.f32 %v658_v5, %v640_v7  ;;  %v699_v11 = vpop.f32.mrf.mxu1  ;;  %941 = vmatmul.bf16.vlgmr.msrb.gmra.mxu3 %v713_v8  ;;  %979 = vmatmul.bf16.vlgmr.msra.gmra.mxu1 %v713_v8  ;;  %v681_v15 = vadd.f32 %v680_v10, %v465_v54 }
 0x133   : > { %v706_v13 = vmax.f32 %v659_v9, 0.0  ;;  %v700_v19 = vadd.f32 %v699_v11, %v681_v15 }
 0x135   : > { %v712_v14 = vpack.c.bf16 %v706_v13, %v704_v12  ;;  %v709_v24 = vmax.f32 %v700_v19, 0.0 }
 0x136   : > { %v642_v16 = vpop.f32.mrf.mxu2 }
 0x137   : > { %v661_v17 = vpop.f32.mrf.mxu3  ;;  %922 = vmatmul.bf16.vlgmr.msrb.gmra.mxu2 %v712_v14  ;;  %960 = vmatmul.bf16.vlgmr.msra.gmra.mxu0 %v712_v14  ;;  %v643_v21 = vadd.f32 %v642_v16, %v464_v58 }
 0x138   : > { %v682_v18 = vpop.f32.mrf.mxu0 }
 0x139   : > { %v683_v20 = vadd.f32 %v682_v18, %v465_v54  ;;  %v701_v22 = vpop.f32.mrf.mxu1  ;;  %v662_v27 = vadd.f32 %v661_v17, %v643_v21 }
 0x13b   : > { %v702_v23 = vadd.f32 %v701_v22, %v683_v20  ;;  %v708_v32 = vmax.f32 %v662_v27, 0.0 }
 0x13d   : > { %v711_v25 = vmax.f32 %v702_v23, 0.0 }
 0x13e   : > { %v644_v26 = vpop.f32.mrf.mxu2 }
 0x13f   : > { %v645_v28 = vadd.f32 %v644_v26, %v464_v58  ;;  %v663_v29 = vpop.f32.mrf.mxu3  ;;  %v715_v30 = vpack.c.bf16 %v711_v25, %v709_v24  ;;  %v750_v58 = vperm.slane %v748_v49, 0 }
 0x141   : > { %v664_v31 = vadd.f32 %v663_v29, %v645_v28  ;;  %946 = vmatmul.bf16.gmra.mxu3 %v715_v30  ;;  %984 = vmatmul.bf16.gmra.mxu1 %v715_v30 }
 0x143   : > { %v710_v33 = vmax.f32 %v664_v31, 0.0  ;;  %v1691_v31 = vld [vmem:[%s2272_s8] ss:$0 sm:$0xff] }
 0x145   : > { %v714_v34 = vpack.c.bf16 %v710_v33, %v708_v32 }
 0x147   : > { %927 = vmatmul.bf16.gmra.mxu2 %v714_v34  ;;  %965 = vmatmul.bf16.gmra.mxu0 %v714_v34 }
 0x1ae   : > { %v980_v48 = vpop.f32.mrf.mxu1 }
 0x1b4   : > { %v961_v50 = vpop.f32.mrf.mxu0  ;;  %v942_v54 = vpop.f32.mrf.mxu3 }
 0x1b5   : > { %v962_v55 = vadd.f32 %v961_v50, %v751_v53 }
 0x1b6   : > { %v982_v56 = vpop.f32.mrf.mxu1 }
 0x1b7   : > { %v981_v59 = vadd.f32 %v980_v48, %v962_v55 }
 0x1b9   : > { %v991_v63 = vmax.f32 %v981_v59, 0.0 }
 0x1ba   : > { %v923_v57 = vpop.f32.mrf.mxu2 }
 0x1bb   : > { %v924_v60 = vadd.f32 %v923_v57, %v750_v58 }
 0x1bc   : > { %v963_v51 = vpop.f32.mrf.mxu0  ;;  %v944_v62 = vpop.f32.mrf.mxu3 }
 0x1bd   : > { %v964_v52 = vadd.f32 %v963_v51, %v751_v53  ;;  %v943_v2 = vadd.f32 %v942_v54, %v924_v60 }
 0x1be   : > { %v985_v5 = vpop.f32.mrf.mxu1 }
 0x1bf   : > { %v983_v61 = vadd.f32 %v982_v56, %v964_v52  ;;  %v990_v8 = vmax.f32 %v943_v2, 0.0 }
 0x1c1   : > { %v993_v0 = vmax.f32 %v983_v61, 0.0 }
 0x1c2   : > { %v925_v1 = vpop.f32.mrf.mxu2 }
 0x1c3   : > { %v999_v3 = vpack.c.bf16 %v993_v0, %v991_v63  ;;  %v926_v4 = vadd.f32 %v925_v1, %v750_v58 }
 0x1c4   : > { %v966_v6 = vpop.f32.mrf.mxu0  ;;  %v947_v12 = vpop.f32.mrf.mxu3 }
 0x1c5   : > { %v945_v7 = vadd.f32 %v944_v62, %v926_v4  ;;  %1161 = vmatmul.bf16.vlgmr.msrb.gmra.mxu1 %v999_v3  ;;  %v967_v11 = vadd.f32 %v966_v6, %v751_v53 }
 0x1c6   : > { %v987_v17 = vpop.f32.mrf.mxu1 }
 0x1c7   : > { %v992_v9 = vmax.f32 %v945_v7, 0.0  ;;  %v986_v15 = vadd.f32 %v985_v5, %v967_v11 }
 0x1c9   : > { %v998_v10 = vpack.c.bf16 %v992_v9, %v990_v8  ;;  %v995_v20 = vmax.f32 %v986_v15, 0.0 }
 0x1ca   : > { %v928_v13 = vpop.f32.mrf.mxu2 }
 0x1cb   : > { %1142 = vmatmul.bf16.vlgmr.msrb.gmra.mxu0 %v998_v10  ;;  %v929_v18 = vadd.f32 %v928_v13, %v750_v58 }
 0x1cc   : > { %v968_v14 = vpop.f32.mrf.mxu0  ;;  %v949_v26 = vpop.f32.mrf.mxu3 }
 0x1cd   : > { %v969_v16 = vadd.f32 %v968_v14, %v751_v53  ;;  %v948_v23 = vadd.f32 %v947_v12, %v929_v18 }
 0x1cf   : > { %v988_v19 = vadd.f32 %v987_v17, %v969_v16  ;;  %v994_v28 = vmax.f32 %v948_v23, 0.0 }
 0x1d1   : > { %v997_v21 = vmax.f32 %v988_v19, 0.0 }
 0x1d2   : > { %v930_v22 = vpop.f32.mrf.mxu2 }
 0x1d3   : > { %v1001_v24 = vpack.c.bf16 %v997_v21, %v995_v20  ;;  %v931_v25 = vadd.f32 %v930_v22, %v750_v58 }
 0x1d5   : > { %v950_v27 = vadd.f32 %v949_v26, %v931_v25  ;;  %1166 = vmatmul.bf16.vlgmr.msra.gmra.mxu3 %v1001_v24 }
 0x1d7   : > { %v996_v29 = vmax.f32 %v950_v27, 0.0 }
 0x1d9   : > { %v1000_v30 = vpack.c.bf16 %v996_v29, %v994_v28 }
 0x1db   : > { %1147 = vmatmul.bf16.vlgmr.msra.gmra.mxu2 %v1000_v30 }
 0x242   : > { %v1162_v32 = vpop.f32.mrf.mxu1 }
 0x248   : > { %v1143_v33 = vpop.f32.mrf.mxu0 }
 0x249   : > { %v1144_v34 = vadd.f32 %v1691_v31, %v1143_v33 }
 0x24a   : > { %v1164_v38 = vpop.f32.mrf.mxu1 }
 0x24b   : > { %v1163_v35 = vadd.f32 %v1162_v32, %v1144_v34 }
 0x24d   : > { %1172 = vst [vmem:[%s334_s23] sm:$0xff] %v1163_v35 }
 0x250   : > { %v1145_v36 = vpop.f32.mrf.mxu0 }
 0x251   : > { %v1146_v37 = vadd.f32 %v1691_v31, %v1145_v36 }
 0x253   : > { %v1165_v39 = vadd.f32 %v1164_v38, %v1146_v37 }
 0x255   : > { %1173 = vst [vmem:[%s334_s23 + $0x8] sm:$0xff] %v1165_v39 }
 0x258   : > { %v1167_v40 = vpop.f32.mrf.mxu3 }
 0x25e   : > { %v1148_v41 = vpop.f32.mrf.mxu2 }
 0x25f   : > { %v1149_v42 = vadd.f32 %v1691_v31, %v1148_v41 }
 0x260   : > { %v1169_v46 = vpop.f32.mrf.mxu3 }
 0x261   : > { %v1168_v43 = vadd.f32 %v1167_v40, %v1149_v42 }
 0x263   : > { %1174 = vst [vmem:[%s334_s23 + $0x10] sm:$0xff] %v1168_v43 }
 0x266   : > { %v1150_v44 = vpop.f32.mrf.mxu2 }
 0x267   : > { %v1151_v45 = vadd.f32 %v1691_v31, %v1150_v44 }
 0x269   : > { %v1170_v47 = vadd.f32 %v1169_v46, %v1151_v45 }
 0x26b   : > { %1175 = vst [vmem:[%s334_s23 + $0x18] sm:$0xff] %v1170_v47 }
 0x26c PF: > { %s19_s30 = sadd.s32 1, %s1698_s30  }
 0x26d   : > { %p16_p4 = scmp.ge.s32.totalorder %s19_s30, 5  }
 0x26f   :  { %18 = sbr.rel (!%p16_p4) target bundleno = 1 (0x1), region = 86 }

</bundles_post_ra>
